<compile_context>
chip_gen: v5e
topology: v5e:2x2
jax: 0.10.0
libtpu: 0.0.40
codegen_flags: <defaults>
</compile_context>

<pallas_src>
import functools

import jax
import jax.numpy as jnp
import numpy as np
from jax.experimental import pallas as pl
from jax.experimental.pallas import tpu as pltpu


# ----------------------------------------------------------------------------
# Stage 1: per-class prototype accumulation (normalized-feature sums + counts)
# ----------------------------------------------------------------------------
def _proto_accum_kernel(lbl_ref, fnew_ref, fold_ref,
                        accn_ref, acco_ref, cnt_ref,
                        *, old_classes, hw, tile, n_tiles, half,
                        ragged, has_phantom):
    c = pl.program_id(1)          # core-split index over pixel-tile halves
    j = pl.program_id(2)          # pixel-tile index within this split
    jt = c * half + j             # global pixel-tile index (scalar)

    @pl.when(j == 0)
    def _():
        accn_ref[...] = jnp.zeros_like(accn_ref)
        acco_ref[...] = jnp.zeros_like(acco_ref)
        cnt_ref[...] = jnp.zeros_like(cnt_ref)

    lbl = lbl_ref[...]                              # (1, T) int32
    xn = fnew_ref[...].astype(jnp.float32)          # (D, T)
    xo = fold_ref[...].astype(jnp.float32)          # (D, T)

    if ragged:
        # Only emitted when the pixel tile does not divide HW (tile chooser
        # prefers a dividing tile, so the common case pays nothing here).
        # The masks are load-bearing: padded lanes of the last block hold
        # undefined data that would otherwise poison the MXU contraction.
        lane = jax.lax.broadcasted_iota(jnp.int32, lbl.shape, 1)    # (1, T)
        valid = (jt * tile + lane) < hw
        lbl = jnp.where(valid, lbl, -1)
        xn = jnp.where(valid, xn, 0.0)
        xo = jnp.where(valid, xo, 0.0)

    # Per-pixel inverse L2 norm over channels (F.normalize(dim=0), eps=1e-12).
    # rsqrt lives on the EUP slot; 1e-24 == (1e-12)^2.
    inv_n = jax.lax.rsqrt(
        jnp.maximum(jnp.sum(xn * xn, axis=0, keepdims=True), 1e-24))
    inv_o = jax.lax.rsqrt(
        jnp.maximum(jnp.sum(xo * xo, axis=0, keepdims=True), 1e-24))

    # One-hot over the old classes only; the inverse norm is folded into the
    # (O,T) one-hot (cheap) instead of the (D,T) features (expensive).
    cls = jax.lax.broadcasted_iota(jnp.int32, (old_classes, tile), 0)
    oh = (cls == lbl).astype(jnp.float32)           # (O, T)
    oh_n = oh * inv_n
    oh_o = oh * inv_o

    dims = (((1,), (1,)), ((), ()))  # contract over the pixel (lane) axis

    def _accumulate():
        accn_ref[...] += jax.lax.dot_general(
            oh_n, xn, dims, preferred_element_type=jnp.float32)
        acco_ref[...] += jax.lax.dot_general(
            oh_o, xo, dims, preferred_element_type=jnp.float32)
        cnt_ref[...] += jnp.sum(oh, axis=1, keepdims=True)

    if has_phantom:
        # The core split padded the tile count; skip the duplicated last tile.
        pl.when(jt < n_tiles)(_accumulate)
    else:
        _accumulate()


# ----------------------------------------------------------------------------
# Stage 2: prototype-wise relation distillation loss over (O, D) prototypes
# ----------------------------------------------------------------------------
def _relation_loss_kernel(sum_new_ref, sum_old_ref, cnt_ref, out_ref,
                          *, current_temp, past_temp):
    cnt = cnt_ref[...]                                  # (O, 1)
    denom = jnp.maximum(cnt, 1.0)                       # absent classes -> zero rows
    m = sum_new_ref[...] / denom                        # (O, D)
    mo = sum_old_ref[...] / denom                       # (O, D)

    o = m.shape[0]
    dims = (((1,), (1,)), ((), ()))
    sim1 = jax.lax.dot_general(
        m, m, dims, preferred_element_type=jnp.float32) / current_temp
    sim2 = jax.lax.dot_general(
        mo, mo, dims, preferred_element_type=jnp.float32) / past_temp

    row = jax.lax.broadcasted_iota(jnp.int32, (o, o), 0)
    col = jax.lax.broadcasted_iota(jnp.int32, (o, o), 1)
    offd = row != col
    maskf = offd.astype(jnp.float32)

    # torch keeps a zeroed diagonal inside the running max (sim * mask).
    s1 = sim1 - jnp.max(sim1 * maskf, axis=1, keepdims=True)
    s2 = sim2 - jnp.max(sim2 * maskf, axis=1, keepdims=True)

    e1 = jnp.where(offd, jnp.exp(s1), 0.0)
    e2 = jnp.where(offd, jnp.exp(s2), 0.0)
    z1 = jnp.sum(e1, axis=1, keepdims=True)
    z2 = jnp.sum(e2, axis=1, keepdims=True)

    logp1 = s1 - jnp.log(z1)        # log softmax over off-diagonal entries
    p2 = e2 / z2
    terms = jnp.where(offd, -p2 * logp1, 0.0)
    row_loss = jnp.sum(terms, axis=1, keepdims=True)                 # (O, 1)
    out_ref[...] = jnp.sum(row_loss, axis=0, keepdims=True) / o


# ----------------------------------------------------------------------------
# Wrapper
# ----------------------------------------------------------------------------
def _choose_pixel_tile(hw, d, target_bytes=4 << 20):
    """Pick a pixel-tile: prefer a 128-multiple divisor of HW (no in-kernel
    masking), sized so the per-block f32 intermediates are ~target_bytes."""
    budget = max(128, (target_bytes // (d * 4)) // 128 * 128)
    if hw <= budget:
        return hw                      # one full block (always layout-legal)
    t = budget
    while t >= 128:
        if hw % t == 0:
            return t                   # divides HW -> no masking emitted
        t -= 128
    return budget                      # ragged fallback (masking emitted)


def prototype_relation_distillation_loss(features, features_old, labels, *,
                                         num_classes, old_classes,
                                         current_temp=0.2, past_temp=0.01,
                                         pixel_tile=None,
                                         target_block_bytes=4 << 20,
                                         core_splits=None):
    del num_classes  # only classes < old_classes contribute to the loss
    N, D, H, W = features.shape
    HW = H * W
    O = old_classes

    # Free reshapes of the NCHW inputs (no transpose / pad / dtype-cast pass);
    # features are streamed in their native dtype (pass bf16 to halve HBM).
    f3 = features.reshape(N, D, HW)
    fo3 = features_old.reshape(N, D, HW)
    lbl3 = labels.astype(jnp.int32).reshape(N, 1, HW)

    tile = (pixel_tile if pixel_tile is not None
            else _choose_pixel_tile(HW, D, target_block_bytes))
    n_tiles = pl.cdiv(HW, tile)
    ragged = (HW % tile) != 0

    # Explicit 2-way split of the pixel-tile axis when N == 1 so both v7x
    # TensorCores get work (v5e/v6e simply iterate it; negligible cost).
    if core_splits is None:
        splits = 2 if N == 1 else 1
    else:
        splits = core_splits
    splits = max(1, min(splits, n_tiles))
    half = pl.cdiv(n_tiles, splits)
    has_phantom = splits * half != n_tiles

    def pix_idx(c, j):
        jt = c * half + j
        if has_phantom:
            jt = jnp.minimum(jt, n_tiles - 1)
        return jt

    kernel = functools.partial(
        _proto_accum_kernel, old_classes=O, hw=HW, tile=tile,
        n_tiles=n_tiles, half=half, ragged=ragged, has_phantom=has_phantom)

    accn, acco, cnt = pl.pallas_call(
        kernel,
        out_shape=(jax.ShapeDtypeStruct((N, splits, O, D), jnp.float32),
                   jax.ShapeDtypeStruct((N, splits, O, D), jnp.float32),
                   jax.ShapeDtypeStruct((N, splits, O, 1), jnp.float32)),
        grid_spec=pltpu.PrefetchScalarGridSpec(
            num_scalar_prefetch=0,
            grid=(N, splits, half),
            in_specs=[
                pl.BlockSpec((None, 1, tile),
                             lambda n, c, j: (n, 0, pix_idx(c, j))),
                pl.BlockSpec((None, D, tile),
                             lambda n, c, j: (n, 0, pix_idx(c, j))),
                pl.BlockSpec((None, D, tile),
                             lambda n, c, j: (n, 0, pix_idx(c, j))),
            ],
            out_specs=[
                pl.BlockSpec((None, None, O, D), lambda n, c, j: (n, c, 0, 0)),
                pl.BlockSpec((None, None, O, D), lambda n, c, j: (n, c, 0, 0)),
                pl.BlockSpec((None, None, O, 1), lambda n, c, j: (n, c, 0, 0)),
            ],
        ),
        compiler_params=pltpu.CompilerParams(
            dimension_semantics=("parallel", "parallel", "arbitrary"),
            vmem_limit_bytes=48 << 20),
    )(lbl3, f3, fo3)

    # Tiny cross-(batch, split) reduction of the partial prototype sums.
    sum_new = jnp.sum(accn, axis=(0, 1))              # (O, D)
    sum_old = jnp.sum(acco, axis=(0, 1))              # (O, D)
    counts = jnp.sum(cnt, axis=(0, 1))                # (O, 1)

    rel = functools.partial(_relation_loss_kernel,
                            current_temp=current_temp, past_temp=past_temp)
    loss = pl.pallas_call(
        rel,
        out_shape=jax.ShapeDtypeStruct((1, 1), jnp.float32),
        grid_spec=pltpu.PrefetchScalarGridSpec(
            num_scalar_prefetch=0,
            grid=(1,),
            in_specs=[pl.BlockSpec((O, D), lambda i: (0, 0)),
                      pl.BlockSpec((O, D), lambda i: (0, 0)),
                      pl.BlockSpec((O, 1), lambda i: (0, 0))],
            out_specs=pl.BlockSpec((1, 1), lambda i: (0, 0)),
        ),
    )(sum_new, sum_old, counts)
    return loss[0, 0]


# ----------------------------------------------------------------------------
# Pure-numpy (float64) reference mirroring the PyTorch module
# ----------------------------------------------------------------------------
def _reference_numpy(features, features_old, labels, *, num_classes,
                     old_classes, current_temp, past_temp):
    f = np.asarray(features, np.float64)
    fo = np.asarray(features_old, np.float64)
    lbl = np.asarray(labels).reshape(-1)
    N, D, H, W = f.shape
    f = f.transpose(0, 2, 3, 1).reshape(-1, D)        # per-pixel rows
    fo = fo.transpose(0, 2, 3, 1).reshape(-1, D)

    M = np.zeros((num_classes, D))
    Mo = np.zeros((num_classes, D))
    for cl in np.unique(lbl):
        sel = lbl == cl
        fc = f[sel].T                                  # (D, K)
        foc = fo[sel].T
        fc = fc / np.maximum(np.linalg.norm(fc, axis=0, keepdims=True), 1e-12)
        foc = foc / np.maximum(np.linalg.norm(foc, axis=0, keepdims=True), 1e-12)
        M[cl] = fc.mean(axis=1)
        Mo[cl] = foc.mean(axis=1)
    M, Mo = M[:old_classes], Mo[:old_classes]
    O = old_classes

    sim1 = (M @ M.T) / current_temp
    sim2 = (Mo @ Mo.T) / past_temp
    maskf = 1.0 - np.eye(O)
    s1 = sim1 - (sim1 * maskf).max(axis=1, keepdims=True)
    s2 = sim2 - (sim2 * maskf).max(axis=1, keepdims=True)
    offd = maskf.astype(bool)
    e1 = np.exp(s1)[offd].reshape(O, O - 1)
    e2 = np.exp(s2)[offd].reshape(O, O - 1)
    p1 = e1 / e1.sum(axis=1, keepdims=True)
    p2 = e2 / e2.sum(axis=1, keepdims=True)
    return float((-p2 * np.log(p1)).sum(axis=1).mean())


if __name__ == "__main__":
    NUM_CLASSES, OLD_CLASSES = 8, 4
    CUR_T, PAST_T = 0.2, 0.01

    # --- Test 1: f32 streams, tile divides HW (no masking emitted), N=2 -----
    N, D, H, W = 2, 32, 16, 16
    k1, k2, k3 = jax.random.split(jax.random.PRNGKey(0), 3)
    feats = jax.random.normal(k1, (N, D, H, W), dtype=jnp.float32)
    feats_old = jax.random.normal(k2, (N, D, H, W), dtype=jnp.float32)
    labels = jax.random.randint(k3, (N, 1, H, W), 0, NUM_CLASSES,
                                dtype=jnp.int32)

    loss = prototype_relation_distillation_loss(
        feats, feats_old, labels,
        num_classes=NUM_CLASSES, old_classes=OLD_CLASSES,
        current_temp=CUR_T, past_temp=PAST_T)
    loss = float(np.asarray(jax.block_until_ready(loss)))
    ref = _reference_numpy(feats, feats_old, labels,
                           num_classes=NUM_CLASSES, old_classes=OLD_CLASSES,
                           current_temp=CUR_T, past_temp=PAST_T)
    np.testing.assert_allclose(loss, ref, rtol=2e-3, atol=5e-4)

    # --- Test 2: bf16 feature streams (half the HBM traffic), same shapes ---
    feats_bf = feats.astype(jnp.bfloat16)
    feats_old_bf = feats_old.astype(jnp.bfloat16)
    loss_bf = prototype_relation_distillation_loss(
        feats_bf, feats_old_bf, labels,
        num_classes=NUM_CLASSES, old_classes=OLD_CLASSES,
        current_temp=CUR_T, past_temp=PAST_T)
    loss_bf = float(np.asarray(jax.block_until_ready(loss_bf)))
    ref_bf = _reference_numpy(feats_bf.astype(jnp.float32),
                              feats_old_bf.astype(jnp.float32), labels,
                              num_classes=NUM_CLASSES, old_classes=OLD_CLASSES,
                              current_temp=CUR_T, past_temp=PAST_T)
    np.testing.assert_allclose(loss_bf, ref_bf, rtol=5e-3, atol=1e-3)

    # --- Test 3: N=1 (2-way core split), ragged last tile + phantom step ----
    N3, H3, W3 = 1, 24, 24
    k4, k5, k6 = jax.random.split(jax.random.PRNGKey(1), 3)
    feats3 = jax.random.normal(k4, (N3, D, H3, W3), dtype=jnp.float32)
    feats3_old = jax.random.normal(k5, (N3, D, H3, W3), dtype=jnp.float32)
    labels3 = jax.random.randint(k6, (N3, 1, H3, W3), 0, NUM_CLASSES,
                                 dtype=jnp.int32)
    loss3 = prototype_relation_distillation_loss(
        feats3, feats3_old, labels3,
        num_classes=NUM_CLASSES, old_classes=OLD_CLASSES,
        current_temp=CUR_T, past_temp=PAST_T, pixel_tile=128)
    loss3 = float(np.asarray(jax.block_until_ready(loss3)))
    ref3 = _reference_numpy(feats3, feats3_old, labels3,
                            num_classes=NUM_CLASSES, old_classes=OLD_CLASSES,
                            current_temp=CUR_T, past_temp=PAST_T)
    np.testing.assert_allclose(loss3, ref3, rtol=2e-3, atol=5e-4)

    print("KERNEL_OK")
</pallas_src>

<mosaic_0001>
module attributes {stable_mosaic.version = 11 : i64} {
  func.func @_proto_accum_kernel(%arg0: i32, %arg1: i32, %arg2: i32, %arg3: memref<1x1x256xi32, #tpu.memory_space<vmem>>, %arg4: memref<1x32x256xf32, #tpu.memory_space<vmem>>, %arg5: memref<1x32x256xf32, #tpu.memory_space<vmem>>, %arg6: memref<1x1x4x32xf32, #tpu.memory_space<vmem>>, %arg7: memref<1x1x4x32xf32, #tpu.memory_space<vmem>>, %arg8: memref<1x1x4x1xf32, #tpu.memory_space<vmem>>) attributes {dimension_semantics = [#tpu.dimension_semantics<parallel>, #tpu.dimension_semantics<parallel>, #tpu.dimension_semantics<arbitrary>], iteration_bounds = array<i64: 2, 1, 1>, scalar_prefetch = 0 : i64, scratch_operands = 0 : i64, tpu.core_type = #tpu.core_type<tc>, window_params = [{transform_indices = @transform_0, window_bounds = array<i64: 1, 1, 256>}, {transform_indices = @transform_1, window_bounds = array<i64: 1, 32, 256>}, {transform_indices = @transform_2, window_bounds = array<i64: 1, 32, 256>}, {transform_indices = @transform_3, window_bounds = array<i64: 1, 1, 4, 32>}, {transform_indices = @transform_4, window_bounds = array<i64: 1, 1, 4, 32>}, {transform_indices = @transform_5, window_bounds = array<i64: 1, 1, 4, 1>}]} {
    %c0_i32 = arith.constant 0 : i32
    %0 = arith.cmpi eq, %arg2, %c0_i32 : i32
    %1 = arith.extui %0 : i1 to i32
    %c0_i32_0 = arith.constant 0 : i32
    %2 = arith.cmpi ne, %1, %c0_i32_0 : i32
    scf.if %2 {
      %cst_39 = arith.constant 0.000000e+00 : f32
      %52 = vector.broadcast %cst_39 : f32 to vector<4x32xf32>
      %c0_40 = arith.constant 0 : index
      %c0_41 = arith.constant 0 : index
      %c0_42 = arith.constant 0 : index
      %c0_43 = arith.constant 0 : index
      %53 = vector.load %arg6[%c0_40, %c0_41, %c0_42, %c0_43] : memref<1x1x4x32xf32, #tpu.memory_space<vmem>>, vector<1x1x4x32xf32>
      %54 = vector.shape_cast %53 : vector<1x1x4x32xf32> to vector<4x32xf32>
      %55 = vector.shape_cast %52 : vector<4x32xf32> to vector<1x1x4x32xf32>
      tpu.vector_store %arg6[%c0_40, %c0_41, %c0_42, %c0_43], %55 {strides = array<i32>} : memref<1x1x4x32xf32, #tpu.memory_space<vmem>>, vector<1x1x4x32xf32>,
      %cst_44 = arith.constant 0.000000e+00 : f32
      %56 = vector.broadcast %cst_44 : f32 to vector<4x32xf32>
      %c0_45 = arith.constant 0 : index
      %c0_46 = arith.constant 0 : index
      %c0_47 = arith.constant 0 : index
      %c0_48 = arith.constant 0 : index
      %57 = vector.load %arg7[%c0_45, %c0_46, %c0_47, %c0_48] : memref<1x1x4x32xf32, #tpu.memory_space<vmem>>, vector<1x1x4x32xf32>
      %58 = vector.shape_cast %57 : vector<1x1x4x32xf32> to vector<4x32xf32>
      %59 = vector.shape_cast %56 : vector<4x32xf32> to vector<1x1x4x32xf32>
      tpu.vector_store %arg7[%c0_45, %c0_46, %c0_47, %c0_48], %59 {strides = array<i32>} : memref<1x1x4x32xf32, #tpu.memory_space<vmem>>, vector<1x1x4x32xf32>,
      %cst_49 = arith.constant 0.000000e+00 : f32
      %60 = vector.broadcast %cst_49 : f32 to vector<4x1xf32>
      %c0_50 = arith.constant 0 : index
      %c0_51 = arith.constant 0 : index
      %c0_52 = arith.constant 0 : index
      %c0_53 = arith.constant 0 : index
      %61 = vector.load %arg8[%c0_50, %c0_51, %c0_52, %c0_53] : memref<1x1x4x1xf32, #tpu.memory_space<vmem>>, vector<1x1x4x1xf32>
      %62 = vector.shape_cast %61 : vector<1x1x4x1xf32> to vector<4x1xf32>
      %63 = vector.shape_cast %60 : vector<4x1xf32> to vector<1x1x4x1xf32>
      tpu.vector_store %arg8[%c0_50, %c0_51, %c0_52, %c0_53], %63 {strides = array<i32>} : memref<1x1x4x1xf32, #tpu.memory_space<vmem>>, vector<1x1x4x1xf32>,
    } else {
    }
    %c0 = arith.constant 0 : index
    %c0_1 = arith.constant 0 : index
    %c0_2 = arith.constant 0 : index
    %3 = vector.load %arg3[%c0, %c0_1, %c0_2] : memref<1x1x256xi32, #tpu.memory_space<vmem>>, vector<1x1x256xi32>
    %4 = vector.shape_cast %3 : vector<1x1x256xi32> to vector<1x256xi32>
    %c0_3 = arith.constant 0 : index
    %c0_4 = arith.constant 0 : index
    %c0_5 = arith.constant 0 : index
    %5 = vector.load %arg4[%c0_3, %c0_4, %c0_5] : memref<1x32x256xf32, #tpu.memory_space<vmem>>, vector<1x32x256xf32>
    %6 = vector.shape_cast %5 : vector<1x32x256xf32> to vector<32x256xf32>
    %c0_6 = arith.constant 0 : index
    %c0_7 = arith.constant 0 : index
    %c0_8 = arith.constant 0 : index
    %7 = vector.load %arg5[%c0_6, %c0_7, %c0_8] : memref<1x32x256xf32, #tpu.memory_space<vmem>>, vector<1x32x256xf32>
    %8 = vector.shape_cast %7 : vector<1x32x256xf32> to vector<32x256xf32>
    %9 = arith.mulf %6, %6 : vector<32x256xf32>
    %cst = arith.constant dense<0.000000e+00> : vector<256xf32>
    %10 = vector.multi_reduction <add>, %9, %cst [0] : vector<32x256xf32> to vector<256xf32>
    %11 = vector.shape_cast %10 : vector<256xf32> to vector<1x256xf32>
    %cst_9 = arith.constant 1.000000e-24 : f32
    %12 = vector.broadcast %cst_9 : f32 to vector<1x256xf32>
    %13 = arith.maximumf %11, %12 : vector<1x256xf32>
    %14 = math.rsqrt %13 : vector<1x256xf32>
    %15 = arith.mulf %8, %8 : vector<32x256xf32>
    %cst_10 = arith.constant dense<0.000000e+00> : vector<256xf32>
    %16 = vector.multi_reduction <add>, %15, %cst_10 [0] : vector<32x256xf32> to vector<256xf32>
    %17 = vector.shape_cast %16 : vector<256xf32> to vector<1x256xf32>
    %cst_11 = arith.constant 1.000000e-24 : f32
    %18 = vector.broadcast %cst_11 : f32 to vector<1x256xf32>
    %19 = arith.maximumf %17, %18 : vector<1x256xf32>
    %20 = math.rsqrt %19 : vector<1x256xf32>
    %21 = tpu.iota {dimensions = array<i32: 0>} : vector<4x256xi32>
    %22 = vector.broadcast %4 : vector<1x256xi32> to vector<4x256xi32>
    %23 = arith.cmpi eq, %21, %22 : vector<4x256xi32>
    %24 = arith.extui %23 : vector<4x256xi1> to vector<4x256xi32>
    %25 = arith.sitofp %24 : vector<4x256xi32> to vector<4x256xf32>
    %26 = vector.broadcast %14 : vector<1x256xf32> to vector<4x256xf32>
    %27 = arith.mulf %25, %26 : vector<4x256xf32>
    %28 = vector.broadcast %20 : vector<1x256xf32> to vector<4x256xf32>
    %29 = arith.mulf %25, %28 : vector<4x256xf32>
    %c0_12 = arith.constant 0 : index
    %c0_13 = arith.constant 0 : index
    %c0_14 = arith.constant 0 : index
    %c0_15 = arith.constant 0 : index
    %30 = vector.load %arg6[%c0_12, %c0_13, %c0_14, %c0_15] : memref<1x1x4x32xf32, #tpu.memory_space<vmem>>, vector<1x1x4x32xf32>
    %31 = vector.shape_cast %30 : vector<1x1x4x32xf32> to vector<4x32xf32>
    %cst_16 = arith.constant dense<0.000000e+00> : vector<4x32xf32>
    %32 = tpu.matmul %27, %6, %cst_16 {dimension_numbers = #tpu.dot_dimension_numbers<[1], [1], [0], [0], [0, 0, 1, 0], [], []>} : vector<4x256xf32>, vector<32x256xf32>, vector<4x32xf32> -> vector<4x32xf32>
    %33 = arith.addf %31, %32 : vector<4x32xf32>
    %c0_17 = arith.constant 0 : index
    %c0_18 = arith.constant 0 : index
    %c0_19 = arith.constant 0 : index
    %c0_20 = arith.constant 0 : index
    %34 = vector.load %arg6[%c0_17, %c0_18, %c0_19, %c0_20] : memref<1x1x4x32xf32, #tpu.memory_space<vmem>>, vector<1x1x4x32xf32>
    %35 = vector.shape_cast %34 : vector<1x1x4x32xf32> to vector<4x32xf32>
    %36 = vector.shape_cast %33 : vector<4x32xf32> to vector<1x1x4x32xf32>
    tpu.vector_store %arg6[%c0_17, %c0_18, %c0_19, %c0_20], %36 {strides = array<i32>} : memref<1x1x4x32xf32, #tpu.memory_space<vmem>>, vector<1x1x4x32xf32>,
    %c0_21 = arith.constant 0 : index
    %c0_22 = arith.constant 0 : index
    %c0_23 = arith.constant 0 : index
    %c0_24 = arith.constant 0 : index
    %37 = vector.load %arg7[%c0_21, %c0_22, %c0_23, %c0_24] : memref<1x1x4x32xf32, #tpu.memory_space<vmem>>, vector<1x1x4x32xf32>
    %38 = vector.shape_cast %37 : vector<1x1x4x32xf32> to vector<4x32xf32>
    %cst_25 = arith.constant dense<0.000000e+00> : vector<4x32xf32>
    %39 = tpu.matmul %29, %8, %cst_25 {dimension_numbers = #tpu.dot_dimension_numbers<[1], [1], [0], [0], [0, 0, 1, 0], [], []>} : vector<4x256xf32>, vector<32x256xf32>, vector<4x32xf32> -> vector<4x32xf32>
    %40 = arith.addf %38, %39 : vector<4x32xf32>
    %c0_26 = arith.constant 0 : index
    %c0_27 = arith.constant 0 : index
    %c0_28 = arith.constant 0 : index
    %c0_29 = arith.constant 0 : index
    %41 = vector.load %arg7[%c0_26, %c0_27, %c0_28, %c0_29] : memref<1x1x4x32xf32, #tpu.memory_space<vmem>>, vector<1x1x4x32xf32>
    %42 = vector.shape_cast %41 : vector<1x1x4x32xf32> to vector<4x32xf32>
    %43 = vector.shape_cast %40 : vector<4x32xf32> to vector<1x1x4x32xf32>
    tpu.vector_store %arg7[%c0_26, %c0_27, %c0_28, %c0_29], %43 {strides = array<i32>} : memref<1x1x4x32xf32, #tpu.memory_space<vmem>>, vector<1x1x4x32xf32>,
    %c0_30 = arith.constant 0 : index
    %c0_31 = arith.constant 0 : index
    %c0_32 = arith.constant 0 : index
    %c0_33 = arith.constant 0 : index
    %44 = vector.load %arg8[%c0_30, %c0_31, %c0_32, %c0_33] : memref<1x1x4x1xf32, #tpu.memory_space<vmem>>, vector<1x1x4x1xf32>
    %45 = vector.shape_cast %44 : vector<1x1x4x1xf32> to vector<4x1xf32>
    %cst_34 = arith.constant dense<0.000000e+00> : vector<4xf32>
    %46 = vector.multi_reduction <add>, %25, %cst_34 [1] : vector<4x256xf32> to vector<4xf32>
    %47 = vector.shape_cast %46 : vector<4xf32> to vector<4x1xf32>
    %48 = arith.addf %45, %47 : vector<4x1xf32>
    %c0_35 = arith.constant 0 : index
    %c0_36 = arith.constant 0 : index
    %c0_37 = arith.constant 0 : index
    %c0_38 = arith.constant 0 : index
    %49 = vector.load %arg8[%c0_35, %c0_36, %c0_37, %c0_38] : memref<1x1x4x1xf32, #tpu.memory_space<vmem>>, vector<1x1x4x1xf32>
    %50 = vector.shape_cast %49 : vector<1x1x4x1xf32> to vector<4x1xf32>
    %51 = vector.shape_cast %48 : vector<4x1xf32> to vector<1x1x4x1xf32>
    tpu.vector_store %arg8[%c0_35, %c0_36, %c0_37, %c0_38], %51 {strides = array<i32>} : memref<1x1x4x1xf32, #tpu.memory_space<vmem>>, vector<1x1x4x1xf32>,
    return
  }
  func.func @transform_0(%arg0: i32, %arg1: i32, %arg2: i32) -> (i32, i32, i32) {
    %c1_i32 = arith.constant 1 : i32
    %0 = arith.muli %arg1, %c1_i32 : i32
    %1 = arith.addi %0, %arg2 : i32
    %c0_i32 = arith.constant 0 : i32
    %c0_i32_0 = arith.constant 0 : i32
    return %arg0, %c0_i32, %1 : i32, i32, i32
  }
  func.func @transform_1(%arg0: i32, %arg1: i32, %arg2: i32) -> (i32, i32, i32) {
    %c1_i32 = arith.constant 1 : i32
    %0 = arith.muli %arg1, %c1_i32 : i32
    %1 = arith.addi %0, %arg2 : i32
    %c0_i32 = arith.constant 0 : i32
    %c0_i32_0 = arith.constant 0 : i32
    return %arg0, %c0_i32, %1 : i32, i32, i32
  }
  func.func @transform_2(%arg0: i32, %arg1: i32, %arg2: i32) -> (i32, i32, i32) {
    %c1_i32 = arith.constant 1 : i32
    %0 = arith.muli %arg1, %c1_i32 : i32
    %1 = arith.addi %0, %arg2 : i32
    %c0_i32 = arith.constant 0 : i32
    %c0_i32_0 = arith.constant 0 : i32
    return %arg0, %c0_i32, %1 : i32, i32, i32
  }
  func.func @transform_3(%arg0: i32, %arg1: i32, %arg2: i32) -> (i32, i32, i32, i32) {
    %c0_i32 = arith.constant 0 : i32
    %c0_i32_0 = arith.constant 0 : i32
    %c0_i32_1 = arith.constant 0 : i32
    return %arg0, %arg1, %c0_i32, %c0_i32_0 : i32, i32, i32, i32
  }
  func.func @transform_4(%arg0: i32, %arg1: i32, %arg2: i32) -> (i32, i32, i32, i32) {
    %c0_i32 = arith.constant 0 : i32
    %c0_i32_0 = arith.constant 0 : i32
    %c0_i32_1 = arith.constant 0 : i32
    return %arg0, %arg1, %c0_i32, %c0_i32_0 : i32, i32, i32, i32
  }
  func.func @transform_5(%arg0: i32, %arg1: i32, %arg2: i32) -> (i32, i32, i32, i32) {
    %c0_i32 = arith.constant 0 : i32
    %c0_i32_0 = arith.constant 0 : i32
    %c0_i32_1 = arith.constant 0 : i32
    return %arg0, %arg1, %c0_i32, %c0_i32_0 : i32, i32, i32, i32
  }
}

</mosaic_0001>

<bundles_post_ra>
// kernel: tpu_custom_call.1
= control target key start
LH: loop header
LB: loop body
LE: loop exit
PB: predicated region body
PF: predicated region fallthrough
CT: control target
= control target key end

     0   :  { %s1461_s0 = inlined_call_operand.hbm [shape: s32[2,1,256], index: 0, kind: input, shape index: {}]   ;;  %s1462_s1 = inlined_call_operand.hbm [shape: f32[2,32,256], index: 1, kind: input, shape index: {}]   ;;  %s1463_s2 = inlined_call_operand.hbm [shape: f32[2,32,256], index: 2, kind: input, shape index: {}]   ;;  %s1464_s3 = inlined_call_operand.hbm [shape: f32[2,1,4,32], index: 3, kind: output, shape index: {0}]   ;;  %s1465_s4 = inlined_call_operand.hbm [shape: f32[2,1,4,32], index: 4, kind: output, shape index: {1}]   ;;  %s1466_s5 = inlined_call_operand.vmem [shape: f32[2,1,4,1], index: 5, kind: output, shape index: {2}]  }
   0x1   :  { %1471 = sst [smem:[#allocation20_spill]] %s1462_s1 }
   0x2   :  { %11 = vsyncpa [#allocation3], 0 }
   0x3   :  { %13 = vsyncpa [#allocation3 + $0x1], 0 }
   0x4   :  { %14 = vsyncpa [#allocation6], 0 }
   0x5   :  { %16 = vsyncpa [#allocation6 + $0x1], 0 }
   0x6   :  { %17 = vsyncpa [#allocation4], 0 }
   0x7   :  { %19 = vsyncpa [#allocation4 + $0x1], 0 }
   0x8   :  { %20 = vsyncpa [#allocation10], 0 }
   0x9   :  { %22 = vsyncpa [#allocation10 + $0x1], 0  ;;  %s1243_s18 = smov 0   ;;  %s1245_s19 = smov 0  }
   0xa   :  { %s1247_s20 = smov 0   ;;  %s1249_s21 = smov 0  }
   0xb   :  { %s1251_s22 = smov 0   ;;  %s1253_s23 = smov 0  }
   0xc LB: > { %1472 = sst [smem:[#allocation15_spill]] %s1188_s18  ;;  %s1274_s24 = sadd.s32 4294967295, %s1208_s23   ;;  %s1208_s23 = sphi %s1253_s23, %s28_s23   ;;  %s1204_s22 = sphi %s1251_s22, %s1491_s22   ;;  %s1200_s21 = sphi %s1249_s21, %s1490_s21   ;;  %s1196_s20 = sphi %s1247_s20, %s1486_s20   ;;  %s1192_s19 = sphi %s1245_s19, %s1489_s19   ;;  %s1188_s18 = sphi %s1243_s18, %s1488_s18  }
   0xd   : > { %1473 = sst [smem:[#allocation16_spill]] %s1196_s20  ;;  %s884_s25 = sadd.s32 4294967294, %s1208_s23  }
   0xe   : > { %s47_s26 = sadd.s32 1, %s1204_s22  ;;  %s58_s27 = sadd.s32 1, %s1196_s20 }
   0xf   : > { %p49_p0 = scmp.ge.s32.totalorder %s47_s26, 2  ;;  %p65_p1 = scmp.ne.s32.totalorder %s1196_s20, %s1192_s19 }
  0x10   : > { %p66_p2 = scmp.eq.s32.totalorder %s1208_s23, 0  ;;  %p71_p3 = scmp.ne.s32.totalorder %s1192_s19, %s1188_s18 }
  0x11   : > { %s1493_s26 = smov (%p49_p0, %s47_s26), 0  ;;  %p72_p5 = scmp.eq.s32.totalorder %s1274_s24, 0 }
  0x12   : > { %1474 = sst [smem:[#allocation17_spill]] %s1493_s26  ;;  %p1286_p4 = por %p66_p2, %p65_p1 }
  0x13   : > { %s53_s29 = ssub.s32 %s1204_s22, %s1493_s26  ;;  %p157_p6 = scmp.eq.s32.totalorder %s1274_s24, 1 }
  0x14   : > { %p56_p7 = scmp.eq.s32.totalorder %s53_s29, 0  ;;  %p1294_p8 = por %p72_p5, %p71_p3 }
  0x15   : > { %p1298_p9 = por %p157_p6, %p65_p1  ;;  %p163_p10 = scmp.eq.s32.totalorder %s884_s25, 1 }
  0x16   : > { %s1303_s7 = scalar_select %p56_p7, %s1196_s20, %s58_s27  }
  0x17   : > { %p1305_p11 = por %p163_p10, %p71_p3  ;;  %p886_p12 = scmp.ge.s32.totalorder %s1208_s23, 2 }
  0x18   : > { %1478 = sst [smem:[#allocation18_spill]] %s1303_s7  ;;  %p939_p13 = scmp.lt.s32.totalorder %s1208_s23, 2 }
  0x19   : > { %s1479_s8 = scalar_select %p1305_p11, 1, 0 }
  0x1a   : > { %s1312_s9 = sand.u32 1, %s1196_s20   ;;  %s261_s10 = sand.u32 1, %s1208_s23  }
  0x1b   : > { %1480 = sst [smem:[#allocation19_spill]] %s1479_s8  ;;  %s889_s11 = sshll.u32 %s1312_s9, 6 }
  0x1c   : > { %p1318_p0 = pnand %p939_p13, %p1286_p4  ;;  %s910_s13 = sshll.u32 %s1204_s22, 6 }
  0x1d   : > { %s1482_s1 = sld [smem:[#allocation20_spill]]  ;;  %s265_s25 = scalar_lea.vmem [#allocation5], %s889_s11 }
  0x1e   : > { %s276_s27 = sshll.u32 %s265_s25, 4  ;;  %s262_s28 = scalar_lea.sflag [#allocation6], %s261_s10  ;;  %s277_s27 = int_to_ptr.vmem [resolvable:$true] %s276_s27 }
  0x1f   : > { %s1210_s29 = smov 256   ;;  %s1211_s26 = smov 16  }
  0x20   : > { %s298_s8 = scalar_lea.hbm %s1463_s2, %s910_s13  ;;  %s290_s15 = scalar_lea.vmem [#allocation7], %s889_s11 }
  0x21   : > { %s299_s14 = sshll.u32 %s298_s8, 4  ;;  %p895_p1 = scmp.ge.s32.totalorder %s1208_s23, 1  ;;  %s300_s14 = int_to_ptr.hbm [resolvable:$true] %s299_s14 }
  0x22   : > { %p309_p2 = scmp.lt.s32.totalorder %s1208_s23, 3  ;;  %s887_s10 = sshll.u32 %s1312_s9, 1 }
  0x23   : > { %s273_s16 = scalar_lea.hbm %s1482_s1, %s910_s13  ;;  %s888_s25 = sshll.u32 %s1204_s22, 1 }
  0x24   : > { %s274_s17 = sshll.u32 %s273_s16, 4  ;;  %s301_s16 = sshll.u32 %s290_s15, 4  ;;  %s275_s17 = int_to_ptr.hbm [resolvable:$true] %s274_s17  ;;  %s302_s16 = int_to_ptr.vmem [resolvable:$true] %s301_s16 }
  0x25   : > { %928 = dma.hbm_to_vmem [thread:$0]  (!%p1318_p0), %s275_s17, 1024, %s277_s27, %s262_s28, %s1210_s29, %s1210_s29, %s1211_s26  }
  0x26   : > { %p310_p3 = pnand %p895_p1, %p309_p2  ;;  %s250_s17 = scalar_lea.hbm %s1461_s0, %s888_s25 }
  0x27   : > { %s252_s27 = sshll.u32 %s250_s17, 4  ;;  %s243_s20 = scalar_lea.vmem [#allocation2], %s887_s10  ;;  %s253_s27 = int_to_ptr.hbm [resolvable:$true] %s252_s27 }
  0x28   : > { %s254_s7 = sshll.u32 %s243_s20, 4  ;;  %s240_s8 = scalar_lea.sflag [#allocation3], %s1312_s9  ;;  %s255_s7 = int_to_ptr.vmem [resolvable:$true] %s254_s7 }
  0x29   : > { %925 = dma.hbm_to_vmem [thread:$0]  (!%p1318_p0), %s253_s27, 32, %s255_s7, %s240_s8  }
  0x2a   : > { %931 = dma.hbm_to_vmem [thread:$0]  (!%p1318_p0), %s300_s14, 1024, %s302_s16, %s262_s28, %s1210_s29, %s1210_s29, %s1211_s26  }
  0x2b   : > { %313 = sbr.rel (%p310_p3) target bundleno = 249 (0xf9), region = 32  ;;  %s1344_s11 = sand.u32 (!%p310_p3), 1, %s1192_s19  }
  0x2c   : > { %s896_s13 = sshll.u32 (!%p310_p3), %s1344_s11, 1  ;;  %s316_s1 = scalar_lea.sflag (!%p310_p3), [#allocation3], %s1344_s11 }
  0x2d   : > { %s1348_s18 = scalar_lea.vmem (!%p310_p3), [#allocation2], %s896_s13 }
  0x30   : > { %1171 = dma.done.wait (%p1294_p8), %s316_s1, 32  }
  0x31   : > { %1173 = vsyncadd (%p1294_p8), %s316_s1, 4294967264  ;;  %s325_s26 = sand.u32 1, %s1274_s24   ;;  %s897_s9 = sshll.u32 %s1344_s11, 6 }
  0x32   : > { %s326_s12 = scalar_lea.sflag [#allocation6], %s325_s26  ;;  %s1356_s28 = scalar_lea.vmem [#allocation5], %s897_s9 }
  0x33   : > { %1175 = dma.done.wait (%p1294_p8), %s326_s12, 2048  }
  0x34   : > { %1177 = vsyncadd (%p1294_p8), %s326_s12, 4294965248  ;;  %s339_s29 = scalar_lea.vmem [#allocation7], %s897_s9  ;;  %v418_v4 = vld [vmem:[%s1356_s28 + $0x30] sm:$0xff]  ;;  %v419_v5 = vld [vmem:[%s1356_s28 + $0x38] sm:$0xff]  ;;  %v524_v28 = vlaneseq  ;;  %v1212_v57 = vmov 0.0   ;;  %vm626_vm2 = vcmask 1043456  }
  0x35   : > { %v426_v0 = vld [vmem:[%s339_s29 + $0x30] sm:$0xff]  ;;  %v427_v1 = vld [vmem:[%s339_s29 + $0x38] sm:$0xff]  ;;  %v424_v2 = vld [vmem:[%s339_s29 + $0x20] sm:$0xff]  ;;  %551 = vmatpush.xpose.msra.mxu0 %v418_v4  ;;  %571 = vmatpush.xpose.msra.mxu1 %v419_v5  ;;  %v434_v34 = vmul.f32 %v418_v4, %v418_v4  ;;  %v435_v37 = vmul.f32 %v419_v5, %v419_v5  ;;  %p395_p4 = scmp.lt.s32.totalorder %s1200_s21, 1  ;;  %s899_s30 = sshll.u32 %s1344_s11, 2  ;;  %vm406_vm15 = vcmask 257024  }
  0x36   : > { %595 = vmatpush.xpose.msra.mxu2 %v426_v0  ;;  %615 = vmatpush.xpose.msra.mxu3 %v427_v1  ;;  %v425_v3 = vld [vmem:[%s339_s29 + $0x28] sm:$0xff]  ;;  %v422_v6 = vld [vmem:[%s339_s29 + $0x10] sm:$0xff]  ;;  %v423_v7 = vld [vmem:[%s339_s29 + $0x18] sm:$0xff]  ;;  %v482_v8 = vmul.f32 %v426_v0, %v426_v0  ;;  %v480_v14 = vmul.f32 %v424_v2, %v424_v2  ;;  %v483_v21 = vmul.f32 %v427_v1, %v427_v1  ;;  %v525_v42 = vshrl.u32 %v524_v28, 7  ;;  %s372_s25 = scalar_lea.vmem [#allocation8], %s899_s30  ;;  %s1391_s17 = scalar_lea.vmem [#allocation9], %s899_s30 }
  0x37   : > { %v478_v9 = vmul.f32 %v422_v6, %v422_v6  ;;  %v479_v10 = vmul.f32 %v423_v7, %v423_v7  ;;  %v416_v11 = vld [vmem:[%s1356_s28 + $0x20] sm:$0xff]  ;;  %v421_v13 = vld [vmem:[%s339_s29 + $0x8] sm:$0xff]  ;;  %v481_v15 = vmul.f32 %v425_v3, %v425_v3  ;;  %v414_v19 = vld [vmem:[%s1356_s28 + $0x10] sm:$0xff]  ;;  %s396_s24 = scalar_select %p395_p4, %s1200_s21, 1  ;;  %407 = vst.msk [vmem:[%s372_s25] sm:$0xf] %vm406_vm15, %v1212_v57 }
  0x38   : > { %v420_v12 = vld [vmem:[%s339_s29] sm:$0xff]  ;;  %v417_v16 = vld [vmem:[%s1356_s28 + $0x28] sm:$0xff]  ;;  %v477_v18 = vmul.f32 %v421_v13, %v421_v13  ;;  %v415_v20 = vld [vmem:[%s1356_s28 + $0x18] sm:$0xff]  ;;  %v430_v22 = vmul.f32 %v414_v19, %v414_v19  ;;  %v432_v30 = vmul.f32 %v416_v11, %v416_v11  ;;  %408 = vst.msk [vmem:[%s1391_s17] sm:$0xf] %vm406_vm15, %v1212_v57  ;;  %s906_s27 = sshll.u32 %s1200_s21, 2 }
  0x39   : > { %v476_v17 = vmul.f32 %v420_v12, %v420_v12  ;;  %v431_v23 = vmul.f32 %v415_v20, %v415_v20  ;;  %v412_v24 = vld [vmem:[%s1356_s28] sm:$0xff]  ;;  %v413_v25 = vld [vmem:[%s1356_s28 + $0x8] sm:$0xff]  ;;  %552 = vmatpush.xpose.msra.mxu0 %v416_v11  ;;  %572 = vmatpush.xpose.msra.mxu1 %v417_v16  ;;  %v433_v31 = vmul.f32 %v417_v16, %v417_v16  ;;  %v411_v32 = vld [vmem:[%s1348_s18] sm:$0x3]  ;;  %s901_s14 = sshll.u32 %s396_s24, 2  ;;  %s659_s8 = scalar_lea.hbm %s1464_s3, %s906_s27 }
  0x3a   : > { %596 = vmatpush.xpose.msra.mxu2 %v424_v2  ;;  %616 = vmatpush.xpose.msra.mxu3 %v425_v3  ;;  %v493_v27 = vadd.f32 %v479_v10, %v477_v18  ;;  %v428_v29 = vmul.f32 %v412_v24, %v412_v24  ;;  %v429_v33 = vmul.f32 %v413_v25, %v413_v25  ;;  %v526_v43 = vperm.slane %v411_v32, 0  ;;  %s401_s10 = scalar_lea.vmem %s1466_s5, %s901_s14  ;;  %s674_s18 = scalar_lea.hbm %s1465_s4, %s906_s27 }
  0x3b   : > { %v484_v26 = vadd.f32 %v478_v9, %v476_v17  ;;  %v527_v44 = vperm.slane %v411_v32, 1  ;;  %s661_s26 = sshll.u32 %s372_s25, 4  ;;  %s663_s9 = sshll.u32 %s659_s8, 4  ;;  %s662_s26 = int_to_ptr.vmem [resolvable:$true] %s661_s26  ;;  %s664_s9 = int_to_ptr.hbm [resolvable:$true] %s663_s9 }
  0x3c   : > { %v494_v36 = vadd.f32 %v493_v27, %v481_v15  ;;  %v436_v38 = vadd.f32 %v430_v22, %v428_v29  ;;  %v445_v39 = vadd.f32 %v431_v23, %v429_v33  ;;  %vm528_vm0 = vcmp.eq.s32.totalorder %v525_v42, %v526_v43  ;;  %s676_s12 = sshll.u32 %s1391_s17, 4  ;;  %s678_s28 = sshll.u32 %s674_s18, 4  ;;  %s1407_s12 = int_to_ptr.vmem [resolvable:$true] %s676_s12  ;;  %s1409_s28 = int_to_ptr.hbm [resolvable:$true] %s678_s28 }
  0x3d   : > { %v485_v35 = vadd.f32 %v484_v26, %v480_v14  ;;  %553 = vmatpush.xpose.msra.mxu0 %v414_v19  ;;  %573 = vmatpush.xpose.msra.mxu1 %v415_v20  ;;  %vm529_vm1 = vcmp.eq.s32.totalorder %v525_v42, %v527_v44  ;;  %v1372_v58 = vsel %vm528_vm0, 1.0, %v1212_v57  ;;  %vm409_vm0 = vcmask 3072   ;;  %s636_s21 = scalar_lea.sflag [#allocation4], %s1344_s11  ;;  %s1104_s29 = sshra.s32 %s664_s9, 4  ;;  %s1105_s29 = int_to_ptr.hbm [resolvable:$true] %s1104_s29 }
  0x3e   : > { %597 = vmatpush.xpose.msra.mxu2 %v422_v6  ;;  %617 = vmatpush.xpose.msra.mxu3 %v423_v7  ;;  %v495_v41 = vadd.f32 %v494_v36, %v483_v21  ;;  %v437_v45 = vadd.f32 %v436_v38, %v432_v30  ;;  %v446_v46 = vadd.f32 %v445_v39, %v433_v31  ;;  %v1375_v63 = vsel %vm529_vm1, 1.0, %v1212_v57  ;;  %s1106_s24 = scalar_lea.hbm %s1105_s29, 4  ;;  %s1110_s15 = scalar_lea.hbm %s1464_s3, 8 }
  0x3f   : > { %v486_v40 = vadd.f32 %v485_v35, %v482_v8  ;;  %v627_v2 = vsel %vm626_vm2, %v1372_v58, 0.0  ;;  %v628_v3 = vsel %vm626_vm2, %v1375_v63, 0.0  ;;  %410 = vst.msk [vmem:[%s401_s10] sm:$0xf] %vm409_vm0, %v1212_v57  ;;  %p1107_p5 = scmp.ne.s32.totalorder %s1105_s29, %s1106_s24  ;;  %p1111_p8 = scmp.lt.s32.totalorder %s1105_s29, %s1464_s3 }
  0x40   : > { %v496_v48 = vrot.slane %v495_v41, 4  ;;  %v438_v49 = vadd.f32 %v437_v45, %v434_v34  ;;  %v447_v50 = vadd.f32 %v446_v46, %v435_v37  ;;  %v629_v6 = vadd.f32 %v628_v3, %v627_v2  ;;  %p1112_p10 = scmp.lt.s32.totalorder %s1110_s15, %s1106_s24 }
  0x41   : > { %v487_v47 = vrot.slane %v486_v40, 4  ;;  %554 = vmatpush.xpose.msra.mxu0 %v412_v24  ;;  %574 = vmatpush.xpose.msra.mxu1 %v413_v25  ;;  %p1108_p6 = pnand %p1107_p5, %p1298_p9 }
  0x42   : > { %598 = vmatpush.xpose.msra.mxu2 %v420_v12  ;;  %618 = vmatpush.xpose.msra.mxu3 %v421_v13  ;;  %v497_v52 = vadd.f32 %v496_v48, %v495_v41  ;;  %v439_v53 = vrot.slane %v438_v49, 4  ;;  %v448_v54 = vrot.slane %v447_v50, 4  ;;  %p1113_p13 = por %p1112_p10, %p1111_p8 }
  0x43   : > { %v488_v51 = vadd.f32 %v487_v47, %v486_v40  ;;  %630 = vadd.xlane.f32.xlu0 %v629_v6  ;;  %p1109_p7 = pneg %p1108_p6 }
  0x44   : > { %v498_v56 = vrot.slane %v497_v52, 2  ;;  %v440_v59 = vadd.f32 %v439_v53, %v438_v49  ;;  %v449_v60 = vadd.f32 %v448_v54, %v447_v50 }
  0x45   : > { %v489_v55 = vrot.slane %v488_v51, 2  ;;  %p1114_p0 = pnand %p1113_p13, %p1109_p7 }
  0x46   : > { %v499_v62 = vadd.f32 %v498_v56, %v497_v52  ;;  %v441_v0 = vrot.slane %v440_v59, 2  ;;  %v450_v1 = vrot.slane %v449_v60, 2  ;;  %v625_v52 = vld [vmem:[%s401_s10] sm:$0xf] }
  0x47   : > { %v490_v61 = vadd.f32 %v489_v55, %v488_v51  ;;  %v538_v55 = vld [vmem:[%s372_s25] sm:$0xf] }
  0x48   : > { %v500_v5 = vrot.slane %v499_v62, 1  ;;  %v442_v7 = vadd.f32 %v441_v0, %v440_v59  ;;  %v451_v8 = vadd.f32 %v450_v1, %v449_v60  ;;  %v582_v60 = vld [vmem:[%s1391_s17] sm:$0xf] }
  0x49   : > { %v491_v4 = vrot.slane %v490_v61, 1 }
  0x4a   : > { %v501_v10 = vadd.f32 %v500_v5, %v499_v62  ;;  %v443_v11 = vrot.slane %v442_v7, 1  ;;  %v452_v12 = vrot.slane %v451_v8, 1 }
  0x4b   : > { %v492_v9 = vadd.f32 %v491_v4, %v490_v61 }
  0x4c   : > { %v503_v14 = vmax.f32 %v501_v10, 1e-24  ;;  %v444_v15 = vadd.f32 %v443_v11, %v442_v7  ;;  %v453_v16 = vadd.f32 %v452_v12, %v451_v8 }
  0x4d   : > { %v502_v13 = vmax.f32 %v492_v9, 1e-24 }
  0x4e   : > { %v454_v17 = vmax.f32 %v444_v15, 1e-24  ;;  %v455_v18 = vmax.f32 %v453_v16, 1e-24  ;;  %vm520_vm5 = vweird.f32 %v503_v14 }
  0x4f   : > { %992 = vrsqrt.f32 %v502_v13  ;;  %vm510_vm3 = vweird.f32 %v502_v13 }
  0x50   : > { %994 = vrsqrt.f32 %v503_v14  ;;  %vm462_vm8 = vweird.f32 %v454_v17  ;;  %vm472_vm11 = vweird.f32 %v455_v18 }
  0x51   : > { %996 = vrsqrt.f32 %v454_v17 }
  0x52   : > { %998 = vrsqrt.f32 %v455_v18 }
  0x55   : > { %v993_v19 = vpop.eup %992 }
  0x56   : > { %v995_v20 = vpop.eup %994  ;;  %v505_v21 = vmul.f32 %v993_v19, %v502_v13  ;;  %vm511_vm4 = vweird.f32 %v993_v19 }
  0x57   : > { %v515_v22 = vmul.f32 %v995_v20, %v503_v14  ;;  %v997_v23 = vpop.eup %996  ;;  %vm521_vm6 = vweird.f32 %v995_v20  ;;  %vm512_vm7 = vmor %vm510_vm3, %vm511_vm4 }
  0x58   : > { %v506_v24 = vmul.f32 %v993_v19, %v505_v21  ;;  %v999_v25 = vpop.eup %998  ;;  %v457_v27 = vmul.f32 %v997_v23, %v454_v17  ;;  %vm463_vm9 = vweird.f32 %v997_v23  ;;  %vm522_vm10 = vmor %vm520_vm5, %vm521_vm6 }
  0x59   : > { %v516_v26 = vmul.f32 %v995_v20, %v515_v22  ;;  %v467_v29 = vmul.f32 %v999_v25, %v455_v18  ;;  %vm473_vm12 = vweird.f32 %v999_v25  ;;  %vm464_vm13 = vmor %vm462_vm8, %vm463_vm9 }
  0x5a   : > { %v507_v28 = vmul.f32 0.5, %v506_v24  ;;  %v458_v31 = vmul.f32 %v997_v23, %v457_v27  ;;  %vm474_vm14 = vmor %vm472_vm11, %vm473_vm12 }
  0x5b   : > { %v517_v30 = vmul.f32 0.5, %v516_v26  ;;  %v468_v33 = vmul.f32 %v999_v25, %v467_v29 }
  0x5c   : > { %v508_v32 = vsub.f32 1.5, %v507_v28  ;;  %v459_v35 = vmul.f32 0.5, %v458_v31 }
  0x5d   : > { %v518_v34 = vsub.f32 1.5, %v517_v30  ;;  %v469_v37 = vmul.f32 0.5, %v468_v33 }
  0x5e   : > { %v509_v36 = vmul.f32 %v993_v19, %v508_v32  ;;  %v460_v39 = vsub.f32 1.5, %v459_v35 }
  0x5f   : > { %v519_v38 = vmul.f32 %v995_v20, %v518_v34  ;;  %v470_v41 = vsub.f32 1.5, %v469_v37 }
  0x60   : > { %v513_v40 = vsel %vm512_vm7, %v993_v19, %v509_v36  ;;  %v461_v44 = vmul.f32 %v997_v23, %v460_v39 }
  0x61   : > { %v536_v42 = vmul.f32 %v1372_v58, %v513_v40  ;;  %v523_v43 = vsel %vm522_vm10, %v995_v20, %v519_v38  ;;  %v471_v46 = vmul.f32 %v999_v25, %v470_v41 }
  0x62   : > { %v537_v45 = vmul.f32 %v1375_v63, %v523_v43  ;;  %v465_v47 = vsel %vm464_vm13, %v997_v23, %v461_v44 }
  0x63   : > { %599 = vmatmul.f32.vlgmr.msra.gmra.mxu2 %v536_v42  ;;  %v534_v48 = vmul.f32 %v1372_v58, %v465_v47  ;;  %v475_v49 = vsel %vm474_vm14, %v999_v25, %v471_v46 }
  0x64   : > { %619 = vmatmul.f32.vlgmr.msra.gmra.mxu3 %v537_v45  ;;  %v535_v50 = vmul.f32 %v1375_v63, %v475_v49 }
  0x65   : > { %555 = vmatmul.f32.vlgmr.msra.gmra.mxu0 %v534_v48 }
  0x66   : > { %575 = vmatmul.f32.vlgmr.msra.gmra.mxu1 %v535_v50 }
  0xb6   : > { %v631_v51 = vpop.xlane.xlu0 %630 }
  0xb7   : > { %v632_v53 = vadd.f32 %v631_v51, %v625_v52 }
  0xb9   : > { %634 = vst.msk [vmem:[%s401_s10] sm:$0xf] %vm409_vm0, %v632_v53 }
  0xe2   : > { %v556_v54 = vpop.f32.mrf.mxu0 }
  0xe3   : > { %v576_v56 = vpop.f32.mrf.mxu1 }
  0xe4   : > { %v577_v57 = vadd.f32 %v576_v56, %v556_v54 }
  0xe6   : > { %v600_v58 = vpop.f32.mrf.mxu2  ;;  %v579_v59 = vadd.f32 %v577_v57, %v538_v55 }
  0xe7   : > { %v620_v61 = vpop.f32.mrf.mxu3 }
  0xe8   : > { %v621_v62 = vadd.f32 %v620_v61, %v600_v58  ;;  %581 = vst.msk [vmem:[%s372_s25] sm:$0xf] %vm406_vm15, %v579_v59 }
  0xea   : > { %v623_v63 = vadd.f32 %v621_v62, %v582_v60 }
  0xeb   : > { %1117 = shalt.err (!%p1114_p0)
}
  0xec   : > { %918 = dma.vmem_to_hbm [thread:$0]  (%p1298_p9), %s662_s26, 64, %s664_s9, %s636_s21   ;;  %624 = vst.msk [vmem:[%s1391_s17] sm:$0xf] %vm406_vm15, %v623_v63 }
  0xed   : > { %s641_s25 = scalar_lea.sflag [#allocation10], %s1344_s11  ;;  %s1132_s27 = sshra.s32 %s1409_s28, 4  ;;  %s1133_s27 = int_to_ptr.hbm [resolvable:$true] %s1132_s27 }
  0xee   : > { %s1134_s20 = scalar_lea.hbm %s1133_s27, 4  ;;  %s1138_s13 = scalar_lea.hbm %s1465_s4, 8 }
  0xef   : > { %p1135_p1 = scmp.ne.s32.totalorder %s1133_s27, %s1134_s20  ;;  %p1139_p4 = scmp.lt.s32.totalorder %s1133_s27, %s1465_s4 }
  0xf0   : > { %p1140_p5 = scmp.lt.s32.totalorder %s1138_s13, %s1134_s20 }
  0xf1   : > { %p1136_p2 = pnand %p1135_p1, %p1298_p9 }
  0xf2   : > { %p1141_p6 = por %p1140_p5, %p1139_p4 }
  0xf3   : > { %p1137_p3 = pneg %p1136_p2 }
  0xf5   : > { %p1142_p7 = pnand %p1141_p6, %p1137_p3 }
  0xf7   : > { %1145 = shalt.err (!%p1142_p7)
}
  0xf8   : > { %919 = dma.vmem_to_hbm [thread:$0]  (%p1298_p9), %s1407_s12, 64, %s1409_s28, %s641_s25  }
  0xf9 PF: > { %s1483_s11 = sld [smem:[#allocation15_spill]]  ;;  %p933_p8 = pnand %p886_p12, %p1305_p11 }
  0xfb   : > { %p934_p10 = pneg %p933_p8 }
  0xff   : > { %s693_s26 = sand.u32 1, %s1483_s11  }
 0x100   : > { %s694_s9 = scalar_lea.sflag [#allocation4], %s693_s26 }
 0x101   : > { %1179 = dma.done.wait (%p934_p10), %s694_s9, 64  }
 0x102   : > { %1181 = vsyncadd (%p934_p10), %s694_s9, 4294967232  ;;  %s704_s21 = scalar_lea.sflag [#allocation10], %s693_s26 }
 0x103   : > { %1183 = dma.done.wait (%p934_p10), %s704_s21, 64  }
 0x104   : > { %1185 = vsyncadd (%p934_p10), %s704_s21, 4294967232  ;;  %s28_s23 = sadd.s32 1, %s1208_s23   ;;  %s1485_s6 = sld [smem:[#allocation16_spill]] }
 0x105   : > { %p25_p13 = scmp.ge.s32.totalorder %s28_s23, 4   ;;  %s1486_s20 = sld [smem:[#allocation18_spill]] }
 0x106   : > { %s1487_s12 = sld [smem:[#allocation17_spill]]  ;;  %s1488_s18 = smov %s1192_s19 }
 0x107   : > { %s1490_s21 = smov %s1204_s22 }
 0x108   :  { %27 = sbr.rel (!%p25_p13) target bundleno = 12 (0xc), region = 134 }
 0x10a   : > { %s1489_s19 = smov %s1485_s6 }
 0x10c   : > { %s1491_s22 = smov %s1487_s12 }
 0x10d   :  { %720 = vsyncpa [#allocation3], 1 }
 0x10e   :  { %722 = vsyncpa [#allocation3 + $0x1], 1 }
 0x10f   :  { %723 = vsyncpa [#allocation6], 1 }
 0x110   :  { %725 = vsyncpa [#allocation6 + $0x1], 1 }
 0x111   :  { %726 = vsyncpa [#allocation4], 1 }
 0x112   :  { %728 = vsyncpa [#allocation4 + $0x1], 1 }
 0x113   :  { %729 = vsyncpa [#allocation10], 1 }
 0x114   :  { %731 = vsyncpa [#allocation10 + $0x1], 1 }

</bundles_post_ra>
